<compile_context>
chip_gen: v6e
topology: v6e:2x2x1
jax: 0.10.0
libtpu: 0.0.40
codegen_flags: <defaults>
</compile_context>

<pallas_src>
import jax
import jax.numpy as jnp
from jax.experimental import pallas as pl
from jax.experimental.pallas import tpu as pltpu


# ----------------------------------------------------------------------------------
# Tiling configuration — sized for the smallest-VMEM generation (v7x: 64 MiB physical).
# ----------------------------------------------------------------------------------
_LANE = 128                        # lane width: last-dim tile alignment
_MXU = 256                         # v6e/v7x MXU is 2x256x256 -> prefer 256-multiples for N
_SUBLANE_BF16 = 16                 # bf16 packs 16 rows / vreg -> M-tile alignment
_TN_CAP = 512                      # max N tile
_TK_CAP = 1024                     # max K tile
_VMEM_BUDGET = 36 * 1024 * 1024    # target double-buffered working set
_VMEM_LIMIT = 48 * 1024 * 1024     # scoped VMEM limit (<= v7x 64 MiB physical)
_SINGLE_BLOCK_BYTES = 2 * 1024 * 1024  # below this, use the single-block fast path


def _round_up(a: int, m: int) -> int:
    return (a + m - 1) // m * m


def _tile_and_pad(dim: int, cap: int, align: int):
    """Pick (tile, padded_dim): tile <= cap, tile % align == 0 (or == padded_dim),
    padded_dim % tile == 0, minimizing padding (largest tile on ties)."""
    d = _round_up(dim, align)
    if d <= cap:
        return d, d                              # single tile spanning the whole dim
    best_t, best_p, best_w = None, None, None
    t = (cap // align) * align
    while t >= align:
        p = _round_up(dim, t)
        w = p - dim
        if best_w is None or w < best_w:
            best_t, best_p, best_w = t, p, w
        if w == 0:
            break
        t -= align
    return best_t, best_p


# ----------------------------------------------------------------------------------
# Kernels
# ----------------------------------------------------------------------------------
def _fc_tiled_kernel(x_ref, w_ref, b_ref, o_ref, acc_ref):
    # x_ref: [tm, tk] bf16; w_ref: [tk, tn] bf16 (pre-transposed); b_ref: [1, tn] f32
    k = pl.program_id(2)
    partial = jnp.dot(x_ref[...], w_ref[...], preferred_element_type=jnp.float32)

    @pl.when(k == 0)
    def _init():
        # Fold the bias into the first partial: straight assign, no zero-init RMW,
        # no finalize-time VPU add over the (tm, tn) tile.
        acc_ref[...] = partial + b_ref[...]

    @pl.when(k > 0)
    def _accum():
        acc_ref[...] += partial

    @pl.when(k == pl.num_programs(2) - 1)
    def _finalize():
        o_ref[...] = acc_ref[...].astype(o_ref.dtype)


def _fc_single_block_kernel(x_ref, wt_ref, b_ref, o_ref):
    # Whole problem in one VMEM block: no grid, no padding, no scratch.
    acc = jnp.dot(x_ref[...], wt_ref[...], preferred_element_type=jnp.float32)
    o_ref[...] = (acc + b_ref[...]).astype(o_ref.dtype)


# ----------------------------------------------------------------------------------
# Tile planning
# ----------------------------------------------------------------------------------
def _plan_nk(D_in: int, D_out: int):
    # N: prefer 256-aligned tiles (full MXU width on v6e/v7x) unless that pads more
    # weight bytes than a 128-aligned plan (HBM bandwidth is the FC roofline).
    tn, np_ = _tile_and_pad(D_out, _TN_CAP, _LANE)
    if _round_up(D_out, _LANE) >= _MXU:
        tn_a, np_a = _tile_and_pad(D_out, _TN_CAP, _MXU)
        if np_a <= np_:
            tn, np_ = tn_a, np_a
    tk, kp = _tile_and_pad(D_in, _TK_CAP, _LANE)
    return tn, np_, tk, kp


def _plan_m(B: int, tn: int, tk: int, out_itemsize: int):
    # VMEM per grid step: x/W/bias double-buffered (bf16 operands), f32 accumulator
    # scratch, double-buffered output block.
    fixed = 2 * (tk * tn * 2) + 2 * (tn * 4)                    # W tiles + bias tiles
    per_row = 2 * (tk * 2) + tn * 4 + 2 * (tn * out_itemsize)   # x + acc + out per M row
    tm_max = max(_SUBLANE_BF16,
                 ((_VMEM_BUDGET - fixed) // per_row) // _SUBLANE_BF16 * _SUBLANE_BF16)
    # Cover the whole (padded) batch when it fits -> M grid dim == 1 and the weight
    # streams from HBM exactly once.
    return _tile_and_pad(B, tm_max, _SUBLANE_BF16)


def _prepare_params(weight, bias, Np: int, Kp: int):
    """Pad + transpose + bf16-cast the static parameters ([K, N] layout, pure-MXU dot).

    One-time cost per parameter set — in a real model cache the result instead of
    recomputing per forward call (keeps pads/transposes off the hot path)."""
    D_out, D_in = weight.shape
    if Np != D_out or Kp != D_in:
        weight = jnp.pad(weight, ((0, Np - D_out), (0, Kp - D_in)))
    if Np != D_out:
        bias = jnp.pad(bias, (0, Np - D_out))
    w_t = weight.T.astype(jnp.bfloat16)              # [Kp, Np]
    b2d = bias.astype(jnp.float32).reshape(1, Np)    # folded into acc at k == 0
    return w_t, b2d


# ----------------------------------------------------------------------------------
# Forward paths
# ----------------------------------------------------------------------------------
def _fc_small(x2d, weight, bias):
    B, D_in = x2d.shape
    D_out = weight.shape[0]
    w_t = weight.T                    # tiny one-time transpose of a static parameter
    b2d = bias.reshape(1, D_out)
    return pl.pallas_call(
        _fc_single_block_kernel,
        out_shape=jax.ShapeDtypeStruct((B, D_out), x2d.dtype),
    )(x2d, w_t, b2d)


def _fc_tiled(x2d, weight, bias):
    B, D_in = x2d.shape
    D_out = weight.shape[0]
    out_dtype = x2d.dtype
    out_itemsize = jnp.dtype(out_dtype).itemsize

    tn, Np, tk, Kp = _plan_nk(D_in, D_out)
    tm, Bp = _plan_m(B, tn, tk, out_itemsize)

    # v7x has 2 TensorCores: if both parallel axes collapsed to a single tile, split M
    # so both cores get work (harmless on single-TC v5e/v6e).
    if Bp == tm and Np == tn and tm >= 2 * _SUBLANE_BF16 and tm % (2 * _SUBLANE_BF16) == 0:
        tm //= 2

    w_t, b2d = _prepare_params(weight, bias, Np, Kp)

    xp = x2d
    if Bp != B or Kp != D_in:
        # TODO(synk): a masked final K/M tile would avoid this per-call pad of x.
        xp = jnp.pad(xp, ((0, Bp - B), (0, Kp - D_in)))
    xp = xp.astype(jnp.bfloat16)      # bf16 operands: 2x MXU rate, half HBM/VMEM bytes

    grid = (Bp // tm, Np // tn, Kp // tk)
    cost = pl.CostEstimate(
        flops=2 * B * D_in * D_out,
        transcendentals=0,
        bytes_accessed=xp.size * 2 + w_t.size * 2 + b2d.size * 4 + Bp * Np * out_itemsize,
    )

    out_p = pl.pallas_call(
        _fc_tiled_kernel,
        out_shape=jax.ShapeDtypeStruct((Bp, Np), out_dtype),
        grid_spec=pltpu.PrefetchScalarGridSpec(
            num_scalar_prefetch=0,
            grid=grid,
            in_specs=[
                pl.BlockSpec((tm, tk), lambda i, j, k: (i, k)),   # x tile
                pl.BlockSpec((tk, tn), lambda i, j, k: (k, j)),   # W.T tile ([K, N])
                pl.BlockSpec((1, tn), lambda i, j, k: (0, j)),    # bias tile
            ],
            out_specs=pl.BlockSpec((tm, tn), lambda i, j, k: (i, j)),
            scratch_shapes=[pltpu.VMEM((tm, tn), jnp.float32)],
        ),
        compiler_params=pltpu.CompilerParams(
            dimension_semantics=("parallel", "parallel", "arbitrary"),
            vmem_limit_bytes=_VMEM_LIMIT,
        ),
        cost_estimate=cost,
    )(xp, w_t, b2d)

    if Bp == B and Np == D_out:
        return out_p
    return out_p[:B, :D_out]


def fc_forward(x, weight, bias):
    """y = x @ weight.T + bias with weight in PyTorch [D_out, D_in] layout.
    Supports arbitrary leading dims on x (flattened like nn.Linear)."""
    D_out, D_in = weight.shape
    assert x.shape[-1] == D_in
    lead = x.shape[:-1]
    x2d = x.reshape(-1, D_in)
    B = x2d.shape[0]

    itemsize = jnp.dtype(x.dtype).itemsize
    total_bytes = (x2d.size + weight.size + bias.size + B * D_out) * itemsize
    if total_bytes <= _SINGLE_BLOCK_BYTES:
        y2d = _fc_small(x2d, weight, bias)       # tiny FC: skip grid/pad machinery
    else:
        y2d = _fc_tiled(x2d, weight, bias)       # bandwidth-efficient tiled path
    return y2d.reshape(*lead, D_out)


# ----------------------------------------------------------------------------------
# Self-test
# ----------------------------------------------------------------------------------
if __name__ == "__main__":
    key = jax.random.PRNGKey(0)
    k1, k2, k3, k4, k5, k6 = jax.random.split(key, 6)

    # --- Test 1: the literal module config (FC_Model(32, 16)), batch 8 -> small path.
    B, D_in, D_out = 8, 32, 16
    bound = 1.0 / (D_in ** 0.5)
    w1 = jax.random.uniform(k1, (D_out, D_in), jnp.float32, -bound, bound)
    b1 = jax.random.uniform(k2, (D_out,), jnp.float32, -bound, bound)
    x1 = jax.random.normal(k3, (B, D_in), jnp.float32)

    y1 = fc_forward(x1, w1, b1)
    jax.block_until_ready(y1)
    y1_ref = x1 @ w1.T + b1
    assert y1.shape == (B, D_out)
    assert jnp.allclose(y1, y1_ref, atol=1e-4, rtol=1e-4)

    # --- Test 2: medium shape -> tiled bf16 path (full-batch M tile, multi N/K tiles).
    B2, D_in2, D_out2 = 256, 2048, 768
    bound2 = 1.0 / (D_in2 ** 0.5)
    w2 = jax.random.uniform(k4, (D_out2, D_in2), jnp.float32, -bound2, bound2)
    b2 = jax.random.uniform(k5, (D_out2,), jnp.float32, -bound2, bound2)
    x2 = jax.random.normal(k6, (B2, D_in2), jnp.float32)

    y2 = fc_forward(x2, w2, b2)
    jax.block_until_ready(y2)
    # Reference with the same bf16 operand rounding (f32 accumulation).
    xr = x2.astype(jnp.bfloat16).astype(jnp.float32)
    wr = w2.astype(jnp.bfloat16).astype(jnp.float32)
    y2_ref = xr @ wr.T + b2
    assert y2.shape == (B2, D_out2)
    assert jnp.allclose(y2, y2_ref, atol=2e-2, rtol=2e-2)

    print("KERNEL_OK")
</pallas_src>

<mosaic_0001>
module attributes {stable_mosaic.version = 11 : i64} {
  func.func @_fc_single_block_kernel(%arg0: memref<8x32xf32, #tpu.memory_space<vmem>>, %arg1: memref<32x16xf32, #tpu.memory_space<vmem>>, %arg2: memref<1x16xf32, #tpu.memory_space<vmem>>, %arg3: memref<8x16xf32, #tpu.memory_space<vmem>>) attributes {dimension_semantics = [], scalar_prefetch = 0 : i64, scratch_operands = 0 : i64, tpu.core_type = #tpu.core_type<tc>} {
    %c0 = arith.constant 0 : index
    %c0_0 = arith.constant 0 : index
    %0 = vector.load %arg0[%c0, %c0_0] : memref<8x32xf32, #tpu.memory_space<vmem>>, vector<8x32xf32>
    %c0_1 = arith.constant 0 : index
    %c0_2 = arith.constant 0 : index
    %1 = vector.load %arg1[%c0_1, %c0_2] : memref<32x16xf32, #tpu.memory_space<vmem>>, vector<32x16xf32>
    %cst = arith.constant dense<0.000000e+00> : vector<8x16xf32>
    %2 = tpu.matmul %0, %1, %cst {dimension_numbers = #tpu.dot_dimension_numbers<[1], [0], [0], [1], [0, 0, 1, 1], [], []>} : vector<8x32xf32>, vector<32x16xf32>, vector<8x16xf32> -> vector<8x16xf32>
    %c0_3 = arith.constant 0 : index
    %c0_4 = arith.constant 0 : index
    %3 = vector.load %arg2[%c0_3, %c0_4] : memref<1x16xf32, #tpu.memory_space<vmem>>, vector<1x16xf32>
    %4 = vector.broadcast %3 : vector<1x16xf32> to vector<8x16xf32>
    %5 = arith.addf %2, %4 : vector<8x16xf32>
    %c0_5 = arith.constant 0 : index
    %c0_6 = arith.constant 0 : index
    %6 = vector.load %arg3[%c0_5, %c0_6] : memref<8x16xf32, #tpu.memory_space<vmem>>, vector<8x16xf32>
    tpu.vector_store %arg3[%c0_5, %c0_6], %5 {strides = array<i32>} : memref<8x16xf32, #tpu.memory_space<vmem>>, vector<8x16xf32>,
    return
  }
}

</mosaic_0001>

<bundles_post_ra>
// kernel: tpu_custom_call.1
= control target key start
LH: loop header
LB: loop body
LE: loop exit
PB: predicated region body
PF: predicated region fallthrough
CT: control target
= control target key end

     0   :  { %v160_v1 = vmov 0.0   ;;  %vm161_vm0 = vmmov 0   ;;  %s204_s0 = inlined_call_operand.vmem [shape: f32[8,32], index: 0, kind: input, shape index: {}]   ;;  %s205_s1 = inlined_call_operand.vmem [shape: f32[32,16], index: 1, kind: input, shape index: {}]   ;;  %s206_s2 = inlined_call_operand.vmem [shape: f32[1,16], index: 2, kind: input, shape index: {}]   ;;  %s207_s3 = inlined_call_operand.hbm [shape: f32[8,16], index: 3, kind: output, shape index: {}]  }
   0x1   :  { %v19_v0 = vld [vmem:[%s205_s1 + $0x18] sm:$0xff]  ;;  %124 = vmatprep.subr.mxu0 %v160_v1  ;;  %v18_v2 = vld [vmem:[%s205_s1 + $0x10] sm:$0xff]  ;;  %132 = vmatprep.mubr.msk.f32.mxu0 %vm161_vm0, %v160_v1 }
   0x2   :  { %125 = vmatpush3.msra.mxu0 %v19_v0 }
   0x3   :  { %8 = vsyncpa [#allocation3], 0  ;;  %126 = vmatprep.subr.mxu0 %v160_v1  ;;  %v17_v3 = vld [vmem:[%s205_s1 + $0x8] sm:$0xff]  ;;  %v16_v4 = vld [vmem:[%s205_s1] sm:$0xff]  ;;  %vm27_vm1 = vcmask 261120   ;;  %s162_s24 = smov [#allocation2]  }
   0x4   :  { %127 = vmatpush3.msra.mxu0 %v18_v2  ;;  %v15_v5 = vld [vmem:[%s204_s0] sm:$0xff]  ;;  %s109_s25 = sshll.u32 %s162_s24, 4  ;;  %vm101_vm2 = vcmask 130048   ;;  %s110_s25 = int_to_ptr.vmem [resolvable:$true] %s109_s25 }
   0x5   :  { %128 = vmatprep.subr.mxu0 %v160_v1  ;;  %v117_v6 = vld [vmem:[%s206_s2] ss:$0 sm:$0xff]  ;;  %s138_s1 = scalar_lea.vmem %s110_s25, 128  ;;  %p143_p1 = scmp.lt.s32.totalorder %s110_s25, %s110_s25 }
   0x6   :  { %129 = vmatpush3.msra.mxu0 %v17_v3  ;;  %p139_p0 = scmp.ne.s32.totalorder %s110_s25, %s138_s1  ;;  %p144_p2 = scmp.lt.s32.totalorder %s138_s1, %s138_s1 }
   0x7   :  { %130 = vmatprep.subr.mxu0 %v160_v1 }
   0x8   :  { %131 = vmatpush3.msra.mxu0 %v16_v4  ;;  %p145_p3 = por %p144_p2, %p143_p1 }
   0x9   :  { %133 = vmatmul.mubr.msk.f32.vlgmr.msra.gmra.mxu0 %vm27_vm1, %v15_v5 }
   0xa   :  { %p146_p4 = pnand %p145_p3, %p139_p0 }
  0xc9   :  { %v97_v7 = vpop.f32.mrf.mxu0 }
  0xca   :  { %v98_v8 = vadd.f32 %v117_v6, %v97_v7 }
  0xcb   :  { %v134_v9 = vpop.f32.mrf.mxu0 }
  0xcc   :  { %102 = vst.msk [vmem:[#allocation2] sm:$0xff] %vm101_vm2, %v98_v8 }
  0xcd   :  { %149 = shalt.err (!%p146_p4)
}
  0xce   :  { %112 = dma.vmem_to_hbm [thread:$0]  %s110_s25, 128, %s207_s3, [#allocation3]  }
  0xcf   :  { %158 = dma.done.wait [#allocation3], 128  }
  0xd0   :  { %159 = vsyncadd [#allocation3], 4294967168 }
  0xd1   :  { %116 = vsyncpa [#allocation3], 1 }

</bundles_post_ra>
